<compile_context>
chip_gen: v7x
topology: tpu7x:2x2x1
jax: 0.10.0
libtpu: 0.0.40
codegen_flags: <defaults>
</compile_context>

<pallas_src>
import functools

import jax
import jax.numpy as jnp
from jax import lax
from jax.experimental import pallas as pl
from jax.experimental.pallas import tpu as pltpu


def _round_up(x, m):
    return ((x + m - 1) // m) * m


def actor_kernel(x_ref, w1_ref, b1_ref, w2_ref, b2_ref, out_ref, *, num_actions):
    # fc1 + tanh (MXU accumulates in f32; bias/tanh in f32 on VPU/EUP).
    x = x_ref[...].astype(w1_ref.dtype)                                   # cast in-kernel
    h = jnp.dot(x, w1_ref[...], preferred_element_type=jnp.float32)      # (TB, Hp)
    h = jnp.tanh(h + b1_ref[...])                                        # broadcast (1, Hp)

    # fc2: padded W2 columns are zero and padded b2 lanes are -1e30, so padded
    # logits are exactly -1e30 -> zero softmax mass, no explicit mask needed.
    logits = jnp.dot(h.astype(w2_ref.dtype), w2_ref[...],
                     preferred_element_type=jnp.float32)                 # (TB, Ap)
    logits = logits + b2_ref[...]                                        # broadcast (1, Ap)

    # Numerically-stable softmax over the padded (lane-dense) action dim, exact divide.
    m = jnp.max(logits, axis=-1, keepdims=True)
    e = jnp.exp(logits - m)
    denom = jnp.sum(e, axis=-1, keepdims=True)
    probs = e / denom

    # Store only the real action columns (output array is (Bp, A) wide).
    out_ref[...] = probs[:, :num_actions].astype(out_ref.dtype)


def actor_forward(state, w1, b1, w2, b2, *, tile_b=1024, matmul_dtype=None):
    """state: (B, state_size) -> action softmax probs (B, num_actions).

    w1: (S, H), b1: (1, H) or (H,), w2: (H, A), b2: (1, A) or (A,).
    matmul_dtype: optional dtype (e.g. jnp.bfloat16) for the matmul operands
                  (weights cast in the wrapper, x cast in-kernel; accumulation stays f32).
    """
    B, S = state.shape
    H = w1.shape[1]
    A = w2.shape[1]

    # Lane-dense padding of hidden and action dims for the in-kernel matmuls.
    Hp = _round_up(H, 128)
    Ap = _round_up(A, 128)

    # Batch tile: multiple of 8, no larger than the batch; keep >= 2 grid steps
    # when B allows so v7x's two TensorCores both get work.
    tile_b = _round_up(max(8, min(tile_b, B)), 8)
    if B >= 16:
        tile_b = min(tile_b, _round_up(pl.cdiv(B, 2), 8))
    Bp = _round_up(B, tile_b)

    # Only pad the batch when strictly needed (avoid an extra HBM pass over state).
    xs = state if Bp == B else jnp.pad(state, ((0, Bp - B), (0, 0)))

    w1p = jnp.pad(w1, ((0, 0), (0, Hp - H)))
    b1p = jnp.pad(jnp.reshape(b1, (1, H)).astype(jnp.float32), ((0, 0), (0, Hp - H)))
    # Padded hidden columns: tanh(0 + 0) = 0 and the corresponding zero W2 rows add nothing.
    w2p = jnp.pad(w2, ((0, Hp - H), (0, Ap - A)))
    # Bake the action-padding mask into the bias: padded lanes get -1e30.
    b2p = jnp.pad(jnp.reshape(b2, (1, A)).astype(jnp.float32),
                  ((0, 0), (0, Ap - A)), constant_values=-1e30)

    if matmul_dtype is not None:
        w1p = w1p.astype(matmul_dtype)   # weights are tiny; x is cast inside the kernel
        w2p = w2p.astype(matmul_dtype)

    grid = (Bp // tile_b,)
    kernel = functools.partial(actor_kernel, num_actions=A)

    out_padded = pl.pallas_call(
        kernel,
        out_shape=jax.ShapeDtypeStruct((Bp, A), jnp.float32),
        grid_spec=pltpu.PrefetchScalarGridSpec(
            num_scalar_prefetch=0,
            grid=grid,
            in_specs=[
                pl.BlockSpec((tile_b, S), lambda i: (i, 0)),   # state tile over batch
                pl.BlockSpec((S, Hp), lambda i: (0, 0)),        # W1 (VMEM-resident)
                pl.BlockSpec((1, Hp), lambda i: (0, 0)),        # b1
                pl.BlockSpec((Hp, Ap), lambda i: (0, 0)),       # W2 (VMEM-resident)
                pl.BlockSpec((1, Ap), lambda i: (0, 0)),        # b2 (with -1e30 pad mask)
            ],
            # Narrow output: last dim == full array dim A, so (8,128) rule is satisfied.
            out_specs=pl.BlockSpec((tile_b, A), lambda i: (i, 0)),
        ),
        compiler_params=pltpu.CompilerParams(
            dimension_semantics=("parallel",),   # batch tiles shard across TCs (v7x)
        ),
    )(xs, w1p, b1p, w2p, b2p)

    return out_padded if Bp == B else out_padded[:B]


def init_actor_params(key, state_size, num_actions, hidden_dims=10):
    """Deterministic init mirroring nn.Linear's default U(-1/sqrt(fan_in), 1/sqrt(fan_in)).

    Weights are stored as (in, out) — transposed relative to PyTorch's (out, in).
    """
    k1, k2, k3, k4 = jax.random.split(key, 4)
    lim1 = 1.0 / jnp.sqrt(jnp.float32(state_size))
    lim2 = 1.0 / jnp.sqrt(jnp.float32(hidden_dims))
    w1 = jax.random.uniform(k1, (state_size, hidden_dims), jnp.float32, -lim1, lim1)
    b1 = jax.random.uniform(k2, (1, hidden_dims), jnp.float32, -lim1, lim1)
    w2 = jax.random.uniform(k3, (hidden_dims, num_actions), jnp.float32, -lim2, lim2)
    b2 = jax.random.uniform(k4, (1, num_actions), jnp.float32, -lim2, lim2)
    return w1, b1, w2, b2


if __name__ == "__main__":
    # Small shapes consistent with the module's forward: state (batch, width*height).
    state_size = 32          # e.g. width*height = 8*4
    num_actions = 4
    hidden_dims = 10         # module default

    key = jax.random.PRNGKey(0)
    k_params, k_state1, k_state2 = jax.random.split(key, 3)
    w1, b1, w2, b2 = init_actor_params(k_params, state_size, num_actions, hidden_dims)

    def ref_fn(x):
        h = jnp.tanh(jnp.dot(x, w1, precision=lax.Precision.HIGHEST) + b1)
        logits = jnp.dot(h, w2, precision=lax.Precision.HIGHEST) + b2
        return jax.nn.softmax(logits, axis=-1)

    # Case 1: tiny batch (single grid step), f32 path.
    batch1 = 8
    state1 = jax.random.normal(k_state1, (batch1, state_size), jnp.float32)
    probs1 = jax.block_until_ready(actor_forward(state1, w1, b1, w2, b2))
    assert probs1.shape == (batch1, num_actions)
    assert jnp.allclose(probs1, ref_fn(state1), atol=2e-3, rtol=2e-3)
    assert jnp.allclose(jnp.sum(probs1, axis=-1), 1.0, atol=1e-3)

    # Case 2: batch not divisible by the tile (padding path + multi-step grid), default tile.
    batch2 = 200
    state2 = jax.random.normal(k_state2, (batch2, state_size), jnp.float32)
    probs2 = jax.block_until_ready(actor_forward(state2, w1, b1, w2, b2))
    assert probs2.shape == (batch2, num_actions)
    assert jnp.allclose(probs2, ref_fn(state2), atol=2e-3, rtol=2e-3)
    assert jnp.allclose(jnp.sum(probs2, axis=-1), 1.0, atol=1e-3)

    # Case 3: bf16 matmul-operand path with an explicit small tile; looser tolerance.
    probs3 = jax.block_until_ready(
        actor_forward(state2, w1, b1, w2, b2, tile_b=64, matmul_dtype=jnp.bfloat16))
    assert probs3.shape == (batch2, num_actions)
    assert jnp.allclose(probs3, ref_fn(state2), atol=5e-2, rtol=5e-2)
    assert jnp.allclose(jnp.sum(probs3, axis=-1), 1.0, atol=1e-3)

    print("KERNEL_OK")
</pallas_src>

<mosaic_0001>
module attributes {stable_mosaic.version = 11 : i64} {
  func.func @actor_kernel(%arg0: i32, %arg1: memref<8x32xf32, #tpu.memory_space<vmem>>, %arg2: memref<32x128xf32, #tpu.memory_space<vmem>>, %arg3: memref<1x128xf32, #tpu.memory_space<vmem>>, %arg4: memref<128x128xf32, #tpu.memory_space<vmem>>, %arg5: memref<1x128xf32, #tpu.memory_space<vmem>>, %arg6: memref<8x4xf32, #tpu.memory_space<vmem>>) attributes {dimension_semantics = [#tpu.dimension_semantics<parallel>], iteration_bounds = array<i64: 1>, scalar_prefetch = 0 : i64, scratch_operands = 0 : i64, tpu.core_type = #tpu.core_type<tc>, window_params = [{transform_indices = @transform_0, window_bounds = array<i64: 8, 32>}, {pipeline_mode = #tpu.pipeline_mode<synchronous>, transform_indices = @transform_1, window_bounds = array<i64: 32, 128>}, {pipeline_mode = #tpu.pipeline_mode<synchronous>, transform_indices = @transform_2, window_bounds = array<i64: 1, 128>}, {pipeline_mode = #tpu.pipeline_mode<synchronous>, transform_indices = @transform_3, window_bounds = array<i64: 128, 128>}, {pipeline_mode = #tpu.pipeline_mode<synchronous>, transform_indices = @transform_4, window_bounds = array<i64: 1, 128>}, {transform_indices = @transform_5, window_bounds = array<i64: 8, 4>}]} {
    %c0 = arith.constant 0 : index
    %c0_0 = arith.constant 0 : index
    %0 = vector.load %arg1[%c0, %c0_0] : memref<8x32xf32, #tpu.memory_space<vmem>>, vector<8x32xf32>
    %c0_1 = arith.constant 0 : index
    %c0_2 = arith.constant 0 : index
    %1 = vector.load %arg2[%c0_1, %c0_2] : memref<32x128xf32, #tpu.memory_space<vmem>>, vector<32x128xf32>
    %cst = arith.constant dense<0.000000e+00> : vector<8x128xf32>
    %2 = tpu.matmul %0, %1, %cst {dimension_numbers = #tpu.dot_dimension_numbers<[1], [0], [0], [1], [0, 0, 1, 1], [], []>} : vector<8x32xf32>, vector<32x128xf32>, vector<8x128xf32> -> vector<8x128xf32>
    %c0_3 = arith.constant 0 : index
    %c0_4 = arith.constant 0 : index
    %3 = vector.load %arg3[%c0_3, %c0_4] : memref<1x128xf32, #tpu.memory_space<vmem>>, vector<1x128xf32>
    %4 = vector.broadcast %3 : vector<1x128xf32> to vector<8x128xf32>
    %5 = arith.addf %2, %4 : vector<8x128xf32>
    %6 = math.tanh %5 : vector<8x128xf32>
    %c0_5 = arith.constant 0 : index
    %c0_6 = arith.constant 0 : index
    %7 = vector.load %arg4[%c0_5, %c0_6] : memref<128x128xf32, #tpu.memory_space<vmem>>, vector<128x128xf32>
    %cst_7 = arith.constant dense<0.000000e+00> : vector<8x128xf32>
    %8 = tpu.matmul %6, %7, %cst_7 {dimension_numbers = #tpu.dot_dimension_numbers<[1], [0], [0], [1], [0, 0, 1, 1], [], []>} : vector<8x128xf32>, vector<128x128xf32>, vector<8x128xf32> -> vector<8x128xf32>
    %c0_8 = arith.constant 0 : index
    %c0_9 = arith.constant 0 : index
    %9 = vector.load %arg5[%c0_8, %c0_9] : memref<1x128xf32, #tpu.memory_space<vmem>>, vector<1x128xf32>
    %10 = vector.broadcast %9 : vector<1x128xf32> to vector<8x128xf32>
    %11 = arith.addf %8, %10 : vector<8x128xf32>
    %cst_10 = arith.constant dense<0xFF800000> : vector<8xf32>
    %12 = vector.multi_reduction <maximumf>, %11, %cst_10 [1] : vector<8x128xf32> to vector<8xf32>
    %13 = vector.shape_cast %12 : vector<8xf32> to vector<8x1xf32>
    %14 = vector.broadcast %13 : vector<8x1xf32> to vector<8x128xf32>
    %15 = arith.subf %11, %14 : vector<8x128xf32>
    %16 = math.exp %15 : vector<8x128xf32>
    %cst_11 = arith.constant dense<0.000000e+00> : vector<8xf32>
    %17 = vector.multi_reduction <add>, %16, %cst_11 [1] : vector<8x128xf32> to vector<8xf32>
    %18 = vector.shape_cast %17 : vector<8xf32> to vector<8x1xf32>
    %19 = vector.broadcast %18 : vector<8x1xf32> to vector<8x128xf32>
    %20 = arith.divf %16, %19 : vector<8x128xf32>
    %21 = vector.extract_strided_slice %20 {offsets = [0, 0], sizes = [8, 4], strides = [1, 1]} : vector<8x128xf32> to vector<8x4xf32>
    %c0_12 = arith.constant 0 : index
    %c0_13 = arith.constant 0 : index
    %22 = vector.load %arg6[%c0_12, %c0_13] : memref<8x4xf32, #tpu.memory_space<vmem>>, vector<8x4xf32>
    tpu.vector_store %arg6[%c0_12, %c0_13], %21 {strides = array<i32>} : memref<8x4xf32, #tpu.memory_space<vmem>>, vector<8x4xf32>,
    return
  }
  func.func @transform_0(%arg0: i32) -> (i32, i32) {
    %c0_i32 = arith.constant 0 : i32
    %c0_i32_0 = arith.constant 0 : i32
    return %arg0, %c0_i32 : i32, i32
  }
  func.func @transform_1(%arg0: i32) -> (i32, i32) {
    %c0_i32 = arith.constant 0 : i32
    %c0_i32_0 = arith.constant 0 : i32
    %c0_i32_1 = arith.constant 0 : i32
    return %c0_i32, %c0_i32_0 : i32, i32
  }
  func.func @transform_2(%arg0: i32) -> (i32, i32) {
    %c0_i32 = arith.constant 0 : i32
    %c0_i32_0 = arith.constant 0 : i32
    %c0_i32_1 = arith.constant 0 : i32
    return %c0_i32, %c0_i32_0 : i32, i32
  }
  func.func @transform_3(%arg0: i32) -> (i32, i32) {
    %c0_i32 = arith.constant 0 : i32
    %c0_i32_0 = arith.constant 0 : i32
    %c0_i32_1 = arith.constant 0 : i32
    return %c0_i32, %c0_i32_0 : i32, i32
  }
  func.func @transform_4(%arg0: i32) -> (i32, i32) {
    %c0_i32 = arith.constant 0 : i32
    %c0_i32_0 = arith.constant 0 : i32
    %c0_i32_1 = arith.constant 0 : i32
    return %c0_i32, %c0_i32_0 : i32, i32
  }
  func.func @transform_5(%arg0: i32) -> (i32, i32) {
    %c0_i32 = arith.constant 0 : i32
    %c0_i32_0 = arith.constant 0 : i32
    return %arg0, %c0_i32 : i32, i32
  }
}

</mosaic_0001>

<bundles_post_ra>
// kernel: tpu_custom_call.1
= control target key start
LH: loop header
LB: loop body
LE: loop exit
PB: predicated region body
PF: predicated region fallthrough
CT: control target
= control target key end

     0   :  { %10 = vsyncpa [#allocation3], 0  ;;  %s530_s0 = inlined_call_operand.hbm [shape: f32[8,32], index: 0, kind: input, shape index: {}]   ;;  %s531_s1 = inlined_call_operand.hbm [shape: f32[32,128], index: 1, kind: input, shape index: {}]   ;;  %s532_s2 = inlined_call_operand.vmem [shape: f32[1,128], index: 2, kind: input, shape index: {}]   ;;  %s533_s3 = inlined_call_operand.hbm [shape: f32[128,128], index: 3, kind: input, shape index: {}]   ;;  %s534_s4 = inlined_call_operand.vmem [shape: f32[1,128], index: 4, kind: input, shape index: {}]   ;;  %s535_s5 = inlined_call_operand.vmem [shape: f32[8,4], index: 5, kind: output, shape index: {}]  }
   0x1   :  { %11 = vsyncpa [#allocation5], 0  ;;  %s441_s18 = smov [#allocation4]   ;;  %s371_s22 = scalar_lea.hbm %s531_s1, 512 }
   0x2   :  { %s27_s19 = sshll.u32 %s441_s18, 4  ;;  %p372_p0 = scmp.ne.s32.totalorder %s531_s1, %s371_s22  ;;  %s28_s19 = int_to_ptr.vmem [resolvable:$true] %s27_s19 }
   0x3   :  { %p375_p1 = scmp.lt.u32.totalorder %s371_s22, %s531_s1 }
   0x5   :  { %p377_p2 = pnand %p375_p1, %p372_p0 }
   0x7   :  { %380 = shalt.err (!%p377_p2)
}
   0x8   :  { %s381_s27 = scalar_lea.vmem %s28_s19, 512  ;;  %p386_p4 = scmp.lt.s32.totalorder %s28_s19, %s28_s19 }
   0x9   :  { %p382_p3 = scmp.ne.s32.totalorder %s28_s19, %s381_s27  ;;  %p387_p5 = scmp.lt.s32.totalorder %s381_s27, %s381_s27 }
   0xb   :  { %p388_p6 = por %p387_p5, %p386_p4 }
   0xd   :  { %p389_p7 = pnand %p388_p6, %p382_p3 }
   0xf   :  { %392 = shalt.err (!%p389_p7)
}
  0x10   :  { %s442_s28 = smov 128   ;;  %s443_s29 = smov 8  }
  0x11   :  { %33 = dma.hbm_to_vmem [thread:$0]  %s531_s1, 512, %s28_s19, [#allocation5], %s442_s28, %s442_s28, %s443_s29  }
  0x12   :  { %s444_s7 = smov [#allocation2]   ;;  %s445_s9 = smov [#allocation6]  }
  0x13   :  { %s18_s8 = sshll.u32 %s444_s7, 4  ;;  %s41_s10 = sshll.u32 %s445_s9, 4  ;;  %s19_s8 = int_to_ptr.vmem [resolvable:$true] %s18_s8  ;;  %s42_s10 = int_to_ptr.vmem [resolvable:$true] %s41_s10 }
  0x14   :  { %s393_s13 = scalar_lea.hbm %s530_s0, 128 }
  0x15   :  { %p394_p8 = scmp.ne.s32.totalorder %s530_s0, %s393_s13  ;;  %p397_p9 = scmp.lt.u32.totalorder %s393_s13, %s530_s0 }
  0x17   :  { %p399_p10 = pnand %p397_p9, %p394_p8 }
  0x19   :  { %402 = shalt.err (!%p399_p10)
}
  0x1a   :  { %s403_s1 = scalar_lea.vmem %s19_s8, 128  ;;  %p408_p12 = scmp.lt.s32.totalorder %s19_s8, %s19_s8 }
  0x1b   :  { %p404_p11 = scmp.ne.s32.totalorder %s19_s8, %s403_s1  ;;  %p409_p13 = scmp.lt.s32.totalorder %s403_s1, %s403_s1 }
  0x1d   :  { %p410_p0 = por %p409_p13, %p408_p12 }
  0x1f   :  { %p411_p1 = pnand %p410_p0, %p404_p11 }
  0x21   :  { %414 = shalt.err (!%p411_p1)
}
  0x22   :  { %21 = dma.hbm_to_vmem [thread:$0]  %s530_s0, 128, %s19_s8, [#allocation3]  }
  0x23   :  { %s415_s22 = scalar_lea.hbm %s533_s3, 2048 }
  0x24   :  { %p416_p2 = scmp.ne.s32.totalorder %s533_s3, %s415_s22  ;;  %p419_p3 = scmp.lt.u32.totalorder %s415_s22, %s533_s3 }
  0x26   :  { %p421_p4 = pnand %p419_p3, %p416_p2 }
  0x28   :  { %424 = shalt.err (!%p421_p4)
}
  0x29   :  { %s425_s27 = scalar_lea.vmem %s42_s10, 2048  ;;  %p430_p6 = scmp.lt.s32.totalorder %s42_s10, %s42_s10 }
  0x2a   :  { %p426_p5 = scmp.ne.s32.totalorder %s42_s10, %s425_s27  ;;  %p431_p7 = scmp.lt.s32.totalorder %s425_s27, %s425_s27 }
  0x2c   :  { %p432_p8 = por %p431_p7, %p430_p6 }
  0x2e   :  { %p433_p9 = pnand %p432_p8, %p426_p5 }
  0x30   :  { %436 = shalt.err (!%p433_p9)
}
  0x31   :  { %47 = dma.hbm_to_vmem [thread:$0]  %s533_s3, 2048, %s42_s10, [#allocation5], %s442_s28, %s442_s28, %s443_s29  }
  0x32   :  { %437 = dma.done.wait [#allocation3], 128  }
  0x33   :  { %438 = vsyncadd [#allocation3], 4294967168 }
  0x34   :  { %439 = dma.done.wait [#allocation5], 2560  }
  0x35   :  { %440 = vsyncadd [#allocation5], 4294964736  ;;  %v446_v0 = vmov 0.0|0.0   ;;  %vm447_vm0 = vmmov 0   ;;  %v448_v1 = vmov 0.0   ;;  %v60_v2 = vld [vmem:[#allocation4] sm:$0xff] }
  0x36   :  { %327 = vmatprep.subr.bf16.mxu0 %v446_v0  ;;  %289 = vmatprep.mubr.msk.f32.mxu0 %vm447_vm0, %v448_v1  ;;  %v61_v3 = vld [vmem:[#allocation4 + $0x8] sm:$0xff]  ;;  %v62_v4 = vld [vmem:[#allocation4 + $0x10] sm:$0xff]  ;;  %v63_v6 = vld [vmem:[#allocation4 + $0x18] sm:$0xff]  ;;  %vm71_vm1 = vcmask 261120   ;;  %vm248_vm2 = vcmask 31744  }
  0x37   :  { %333 = vmatprep.subr.bf16.mxu1 %v446_v0  ;;  %324 = vmatprep.mubr.msk.f32.mxu1 %vm447_vm0, %v448_v1  ;;  %v328_v5 = vpack.c.bf16 %v61_v3, %v60_v2  ;;  %v146_v7 = vld [vmem:[#allocation6] sm:$0xff]  ;;  %v147_v8 = vld [vmem:[#allocation6 + $0x8] sm:$0xff]  ;;  %v148_v9 = vld [vmem:[#allocation6 + $0x10] sm:$0xff]  ;;  %v331_v11 = vpack.c.bf16 %v63_v6, %v62_v4 }
  0x38   :  { %v149_v10 = vld [vmem:[#allocation6 + $0x18] sm:$0xff]  ;;  %v334_v12 = vpack.c.bf16 %v147_v8, %v146_v7  ;;  %v150_v14 = vld [vmem:[#allocation6 + $0x20] sm:$0xff]  ;;  %v151_v15 = vld [vmem:[#allocation6 + $0x28] sm:$0xff] }
  0x39   :  { %329 = vmatpush3.bf16.msra.mxu0 %v328_v5  ;;  %v337_v13 = vpack.c.bf16 %v149_v10, %v148_v9  ;;  %v59_v16 = vld [vmem:[#allocation2] sm:$0xff]  ;;  %v340_v17 = vpack.c.bf16 %v151_v15, %v150_v14  ;;  %v152_v18 = vld [vmem:[#allocation6 + $0x30] sm:$0xff]  ;;  %v154_v21 = vld [vmem:[#allocation6 + $0x40] sm:$0xff] }
  0x3a   :  { %330 = vmatprep.subr.bf16.mxu0 %v446_v0  ;;  %335 = vmatpush3.bf16.msra.mxu1 %v334_v12  ;;  %v153_v19 = vld [vmem:[#allocation6 + $0x38] sm:$0xff]  ;;  %v155_v22 = vld [vmem:[#allocation6 + $0x48] sm:$0xff]  ;;  %v156_v24 = vld [vmem:[#allocation6 + $0x50] sm:$0xff] }
  0x3b   :  { %336 = vmatprep.subr.bf16.mxu1 %v446_v0  ;;  %v343_v20 = vpack.c.bf16 %v153_v19, %v152_v18  ;;  %v346_v23 = vpack.c.bf16 %v155_v22, %v154_v21  ;;  %v157_v25 = vld [vmem:[#allocation6 + $0x58] sm:$0xff]  ;;  %v158_v27 = vld [vmem:[#allocation6 + $0x60] sm:$0xff]  ;;  %v159_v28 = vld [vmem:[#allocation6 + $0x68] sm:$0xff] }
  0x3c   :  { %v349_v26 = vpack.c.bf16 %v157_v25, %v156_v24  ;;  %v352_v29 = vpack.c.bf16 %v159_v28, %v158_v27  ;;  %v160_v30 = vld [vmem:[#allocation6 + $0x70] sm:$0xff]  ;;  %v161_v31 = vld [vmem:[#allocation6 + $0x78] sm:$0xff] }
  0x3d   :  { %332 = vmatpush3.bf16.msra.mxu0 %v331_v11  ;;  %v355_v32 = vpack.c.bf16 %v161_v31, %v160_v30  ;;  %v256_v33 = vld [vmem:[%s532_s2] ss:$0 sm:$0xff] }
  0x3e   :  { %338 = vmatpush3.bf16.msra.mxu1 %v337_v13  ;;  %v258_v38 = vld [vmem:[%s534_s4] ss:$0 sm:$0xff] }
  0x3f   :  { %339 = vmatprep.subr.bf16.mxu1 %v446_v0 }
  0x40   :  { %290 = vmatmul.mubr.msk.f32.vlgmr.msra.gmra.mrb[0].mxu0 %vm71_vm1, %v59_v16 }
  0x42   :  { %341 = vmatpush3.bf16.msra.mxu1 %v340_v17 }
  0x43   :  { %342 = vmatprep.subr.bf16.mxu1 %v446_v0 }
  0x46   :  { %344 = vmatpush3.bf16.msra.mxu1 %v343_v20 }
  0x47   :  { %345 = vmatprep.subr.bf16.mxu1 %v446_v0 }
  0x4a   :  { %347 = vmatpush3.bf16.msra.mxu1 %v346_v23 }
  0x4b   :  { %348 = vmatprep.subr.bf16.mxu1 %v446_v0 }
  0x4e   :  { %350 = vmatpush3.bf16.msra.mxu1 %v349_v26 }
  0x4f   :  { %351 = vmatprep.subr.bf16.mxu1 %v446_v0 }
  0x52   :  { %353 = vmatpush3.bf16.msra.mxu1 %v352_v29 }
  0x53   :  { %354 = vmatprep.subr.bf16.mxu1 %v446_v0 }
  0x56   :  { %356 = vmatpush3.bf16.msra.mxu1 %v355_v32 }
 0x113   :  { %v141_v34 = vpop.f32.mrb[0].mxu0 }
 0x114   :  { %v142_v35 = vadd.f32 %v256_v33, %v141_v34  ;;  %v291_v36 = vpop.f32.mrb[1].mxu0 }
 0x116   :  { %365 = vtanh.f32 %v142_v35 }
 0x120   :  { %v366_v37 = vpop.eup %365 }
 0x121   :  { %325 = vmatmul.mubr.f32.vlgmr.msra.gmra.mrb[0].mxu1 %v366_v37 }
 0x1f4   :  { %v235_v39 = vpop.f32.mrb[0].mxu1 }
 0x1f5   :  { %v236_v40 = vadd.f32 %v258_v38, %v235_v39  ;;  %v326_v41 = vpop.f32.mrb[1].mxu1 }
 0x1f7   :  { %239 = vmax.xlane.f32.xlu0 %v236_v40 }
 0x284   :  { %v240_v42 = vpop.xlane.xlu0 %239 }
 0x285   :  { %v241_v43 = vsub.f32 %v236_v40, %v240_v42 }
 0x287   :  { %v242_v44 = vmul.f32 1.442695, %v241_v43 }
 0x289   :  { %367 = vpow2.f32 %v242_v44 }
 0x293   :  { %v368_v45 = vpop.eup %367 }
 0x294   :  { %244 = vadd.xlane.f32.xlu0 %v368_v45 }
 0x321   :  { %v245_v46 = vpop.xlane.xlu0 %244 }
 0x322   :  { %369 = vrcp.f32 %v245_v46 }
 0x32c   :  { %v370_v47 = vpop.eup %369 }
 0x32d   :  { %v247_v48 = vmul.f32 %v370_v47, %v368_v45 }
 0x32f   :  { %249 = vst.msk [vmem:[%s535_s5] sm:$0xff] %vm248_vm2, %v247_v48 }
 0x330   :  { %254 = vsyncpa [#allocation3], 1 }
 0x331   :  { %255 = vsyncpa [#allocation5], 1 }

</bundles_post_ra>
